<compile_context>
chip_gen: v6e
topology: v6e:2x2x1
jax: 0.10.0
libtpu: 0.0.40
codegen_flags: <defaults>
</compile_context>

<pallas_src>
import functools

import jax
import jax.numpy as jnp
from jax.experimental import pallas as pl
from jax.experimental.pallas import tpu as pltpu

_LANES = 128


def _focal_elements(x, tr, alpha, gamma):
    """Elementwise focal loss on a lane-dense (tile_rows, 128) slab.

    x  : f32 (tile_rows, 128)  flattened logits (row-major over original (N, 2))
    tr : i32 (tile_rows, 128)  class id of the owning sample, repeated per class
                               column; -1 marks padding lanes.
    """
    lane = jax.lax.broadcasted_iota(jnp.int32, x.shape, dimension=1)
    cls = lane % 2                       # flat idx = row*128 + lane; 128 is even
    t = (tr == cls).astype(jnp.float32)  # one-hot target, built in-register
    # Numerically stable BCE-with-logits (matches torch's formulation).
    bce = jnp.maximum(x, 0.0) - x * t + jnp.log1p(jnp.exp(-jnp.abs(x)))
    pt = jnp.exp(-bce)
    u = 1.0 - pt
    mod = u * u if gamma == 2 else u ** gamma
    f = alpha * mod * bce
    return jnp.where(tr >= 0, f, 0.0)    # zero out padding lanes


def _focal_sum_kernel(x_ref, t_ref, sum_ref, *, alpha, gamma):
    """reduce=True path: accumulate the scalar sum only (no elementwise store)."""
    @pl.when(pl.program_id(0) == 0)
    def _():
        sum_ref[0, 0] = jnp.float32(0.0)

    x = x_ref[...].astype(jnp.float32)
    f = _focal_elements(x, t_ref[...], alpha, gamma)
    sum_ref[0, 0] += jnp.sum(f)


def _focal_elem_kernel(x_ref, t_ref, out_ref, *, alpha, gamma):
    """reduce=False path: write the lane-dense elementwise loss slab."""
    x = x_ref[...].astype(jnp.float32)
    out_ref[...] = _focal_elements(x, t_ref[...], alpha, gamma)


def focal_loss(inputs, targets, *, alpha=1.0, gamma=2.0, reduce=True,
               tile_rows=1024):
    """inputs: [N, 2] logits (f32 or bf16); targets: int class ids, N elements."""
    assert inputs.ndim == 2 and inputs.shape[1] == 2, "FocalLoss expects (N, 2) logits"
    n = inputs.shape[0]
    total = n * 2

    # ---- lane-dense slab construction (wrapper-side layout plumbing) --------
    rows = -(-total // _LANES)
    rows = -(-rows // 8) * 8                           # sublane multiple of 8
    if rows > tile_rows:
        rows = -(-rows // tile_rows) * tile_rows       # multiple of the tile
        tile = tile_rows
    else:
        tile = rows                                    # single full-array block
    pad = rows * _LANES - total

    compute_dtype = jnp.bfloat16 if inputs.dtype == jnp.bfloat16 else jnp.float32
    x_slab = jnp.pad(inputs.astype(compute_dtype).reshape(-1), (0, pad))
    x_slab = x_slab.reshape(rows, _LANES)
    t_rep = jnp.repeat(targets.reshape(-1).astype(jnp.int32), 2)
    t_slab = jnp.pad(t_rep, (0, pad), constant_values=-1).reshape(rows, _LANES)

    grid = (rows // tile,)
    in_specs = [
        pl.BlockSpec((tile, _LANES), lambda i: (i, 0)),
        pl.BlockSpec((tile, _LANES), lambda i: (i, 0)),
    ]

    if reduce:
        kernel = functools.partial(_focal_sum_kernel, alpha=alpha, gamma=gamma)
        total_sum = pl.pallas_call(
            kernel,
            out_shape=jax.ShapeDtypeStruct((1, 1), jnp.float32),
            grid=grid,
            in_specs=in_specs,
            out_specs=pl.BlockSpec(memory_space=pltpu.MemorySpace.SMEM),
            compiler_params=pltpu.CompilerParams(
                dimension_semantics=("arbitrary",)),
        )(x_slab, t_slab)
        # TODO(synk): on v7x, per-chunk partial sums on a "parallel" axis would
        # engage both TensorCores; single-TC accumulator kept for portability.
        return total_sum[0, 0] / jnp.float32(total)

    kernel = functools.partial(_focal_elem_kernel, alpha=alpha, gamma=gamma)
    f_slab = pl.pallas_call(
        kernel,
        out_shape=jax.ShapeDtypeStruct((rows, _LANES), jnp.float32),
        grid=grid,
        in_specs=in_specs,
        out_specs=pl.BlockSpec((tile, _LANES), lambda i: (i, 0)),
        compiler_params=pltpu.CompilerParams(
            dimension_semantics=("parallel",)),
    )(x_slab, t_slab)
    return f_slab.reshape(-1)[:total].reshape(n, 2)


if __name__ == "__main__":
    key = jax.random.PRNGKey(0)
    k1, k2 = jax.random.split(key)

    N = 16
    logits = jax.random.normal(k1, (N, 2), dtype=jnp.float32)       # (N, 2) logits
    targets = jax.random.randint(k2, (N,), 0, 2, dtype=jnp.int32)   # (N,) class ids

    mean_out = focal_loss(logits, targets, reduce=True)
    elem_out = focal_loss(logits, targets, reduce=False)
    jax.block_until_ready((mean_out, elem_out))

    # Plain-JAX reference (same math, outside Pallas).
    onehot = jnp.eye(2, dtype=jnp.float32)[targets]
    bce = jnp.maximum(logits, 0.0) - logits * onehot + jnp.log1p(jnp.exp(-jnp.abs(logits)))
    pt = jnp.exp(-bce)
    ref_elem = 1.0 * (1.0 - pt) ** 2 * bce
    ref_mean = jnp.mean(ref_elem)

    assert jnp.allclose(mean_out, ref_mean, atol=1e-5, rtol=1e-5), (mean_out, ref_mean)
    assert jnp.allclose(elem_out, ref_elem, atol=1e-5, rtol=1e-5)

    print("KERNEL_OK")
</pallas_src>

<mosaic_0001>
module attributes {stable_mosaic.version = 11 : i64} {
  func.func @_focal_sum_kernel(%arg0: i32, %arg1: memref<8x128xf32, #tpu.memory_space<vmem>>, %arg2: memref<8x128xi32, #tpu.memory_space<vmem>>, %arg3: memref<1x1xf32, #tpu.memory_space<smem>>) attributes {dimension_semantics = [#tpu.dimension_semantics<arbitrary>], iteration_bounds = array<i64: 1>, scalar_prefetch = 0 : i64, scratch_operands = 0 : i64, tpu.core_type = #tpu.core_type<tc>, window_params = [{transform_indices = @transform_0, window_bounds = array<i64: 8, 128>}, {transform_indices = @transform_1, window_bounds = array<i64: 8, 128>}, {transform_indices = @transform_2, window_bounds = array<i64: 1, 1>}]} {
    %c0_i32 = arith.constant 0 : i32
    %0 = arith.cmpi eq, %arg0, %c0_i32 : i32
    %1 = arith.extui %0 : i1 to i32
    %c0_i32_0 = arith.constant 0 : i32
    %2 = arith.cmpi ne, %1, %c0_i32_0 : i32
    scf.if %2 {
      %cst_19 = arith.constant 0.000000e+00 : f32
      %c0_20 = arith.constant 0 : index
      %c0_21 = arith.constant 0 : index
      %55 = memref.load %arg3[%c0_20, %c0_21] : memref<1x1xf32, #tpu.memory_space<smem>>
      memref.store %cst_19, %arg3[%c0_20, %c0_21] : memref<1x1xf32, #tpu.memory_space<smem>>
    } else {
    }
    %c0 = arith.constant 0 : index
    %c0_1 = arith.constant 0 : index
    %3 = vector.load %arg1[%c0, %c0_1] : memref<8x128xf32, #tpu.memory_space<vmem>>, vector<8x128xf32>
    %c0_2 = arith.constant 0 : index
    %c0_3 = arith.constant 0 : index
    %4 = vector.load %arg2[%c0_2, %c0_3] : memref<8x128xi32, #tpu.memory_space<vmem>>, vector<8x128xi32>
    %5 = tpu.iota {dimensions = array<i32: 1>} : vector<8x128xi32>
    %c2_i32 = arith.constant 2 : i32
    %c0_i32_4 = arith.constant 0 : i32
    %6 = arith.cmpi eq, %c2_i32, %c0_i32_4 : i32
    %c1_i32 = arith.constant 1 : i32
    %7 = arith.select %6, %c1_i32, %c2_i32 : i32
    %8 = vector.broadcast %7 : i32 to vector<8x128xi32>
    %9 = arith.remsi %5, %8 : vector<8x128xi32>
    %c0_i32_5 = arith.constant 0 : i32
    %10 = vector.broadcast %c0_i32_5 : i32 to vector<8x128xi32>
    %11 = arith.cmpi ne, %9, %10 : vector<8x128xi32>
    %c0_i32_6 = arith.constant 0 : i32
    %12 = vector.broadcast %c0_i32_6 : i32 to vector<8x128xi32>
    %13 = arith.cmpi slt, %9, %12 : vector<8x128xi32>
    %c0_i32_7 = arith.constant 0 : i32
    %14 = arith.cmpi slt, %7, %c0_i32_7 : i32
    %15 = vector.broadcast %14 : i1 to vector<8x128xi1>
    %16 = vector.broadcast %15 : vector<8x128xi1> to vector<8x128xi1>
    %17 = arith.xori %13, %16 : vector<8x128xi1>
    %18 = arith.andi %17, %11 : vector<8x128xi1>
    %19 = vector.broadcast %7 : i32 to vector<8x128xi32>
    %20 = arith.addi %9, %19 : vector<8x128xi32>
    %21 = arith.select %18, %20, %9 : vector<8x128xi1>, vector<8x128xi32>
    %22 = arith.cmpi eq, %4, %21 : vector<8x128xi32>
    %23 = arith.extui %22 : vector<8x128xi1> to vector<8x128xi32>
    %24 = arith.sitofp %23 : vector<8x128xi32> to vector<8x128xf32>
    %cst = arith.constant 0.000000e+00 : f32
    %25 = vector.broadcast %cst : f32 to vector<8x128xf32>
    %26 = arith.maximumf %3, %25 : vector<8x128xf32>
    %27 = arith.mulf %3, %24 : vector<8x128xf32>
    %28 = arith.subf %26, %27 : vector<8x128xf32>
    %29 = math.absf %3 : vector<8x128xf32>
    %cst_8 = arith.constant 0.000000e+00 : f32
    %30 = vector.broadcast %cst_8 : f32 to vector<8x128xf32>
    %31 = arith.subf %30, %29 : vector<8x128xf32>
    %32 = math.exp %31 : vector<8x128xf32>
    %33 = math.log1p %32 : vector<8x128xf32>
    %34 = arith.addf %28, %33 : vector<8x128xf32>
    %cst_9 = arith.constant 0.000000e+00 : f32
    %35 = vector.broadcast %cst_9 : f32 to vector<8x128xf32>
    %36 = arith.subf %35, %34 : vector<8x128xf32>
    %37 = math.exp %36 : vector<8x128xf32>
    %cst_10 = arith.constant 1.000000e+00 : f32
    %38 = vector.broadcast %cst_10 : f32 to vector<8x128xf32>
    %39 = arith.subf %38, %37 : vector<8x128xf32>
    %40 = arith.mulf %39, %39 : vector<8x128xf32>
    %cst_11 = arith.constant 1.000000e+00 : f32
    %41 = vector.broadcast %cst_11 : f32 to vector<8x128xf32>
    %42 = arith.mulf %41, %40 : vector<8x128xf32>
    %43 = arith.mulf %42, %34 : vector<8x128xf32>
    %c0_i32_12 = arith.constant 0 : i32
    %44 = vector.broadcast %c0_i32_12 : i32 to vector<8x128xi32>
    %45 = arith.cmpi sge, %4, %44 : vector<8x128xi32>
    %cst_13 = arith.constant 0.000000e+00 : f32
    %46 = vector.broadcast %cst_13 : f32 to vector<8x128xf32>
    %47 = arith.select %45, %43, %46 : vector<8x128xi1>, vector<8x128xf32>
    %c0_14 = arith.constant 0 : index
    %c0_15 = arith.constant 0 : index
    %48 = memref.load %arg3[%c0_14, %c0_15] : memref<1x1xf32, #tpu.memory_space<smem>>
    %49 = vector.shape_cast %47 : vector<8x128xf32> to vector<1x8x128xf32>
    %cst_16 = arith.constant dense<0.000000e+00> : vector<1xf32>
    %50 = vector.multi_reduction <add>, %49, %cst_16 [1, 2] : vector<1x8x128xf32> to vector<1xf32>
    %51 = vector.shape_cast %50 : vector<1xf32> to vector<1x1x1xf32>
    %52 = vector.extract %51[0, 0, 0] : f32 from vector<1x1x1xf32>
    %53 = arith.addf %48, %52 : f32
    %c0_17 = arith.constant 0 : index
    %c0_18 = arith.constant 0 : index
    %54 = memref.load %arg3[%c0_17, %c0_18] : memref<1x1xf32, #tpu.memory_space<smem>>
    memref.store %53, %arg3[%c0_17, %c0_18] : memref<1x1xf32, #tpu.memory_space<smem>>
    return
  }
  func.func @transform_0(%arg0: i32) -> (i32, i32) {
    %c0_i32 = arith.constant 0 : i32
    %c0_i32_0 = arith.constant 0 : i32
    return %arg0, %c0_i32 : i32, i32
  }
  func.func @transform_1(%arg0: i32) -> (i32, i32) {
    %c0_i32 = arith.constant 0 : i32
    %c0_i32_0 = arith.constant 0 : i32
    return %arg0, %c0_i32 : i32, i32
  }
  func.func @transform_2(%arg0: i32) -> (i32, i32) {
    %c0_i32 = arith.constant 0 : i32
    %c0_i32_0 = arith.constant 0 : i32
    %c0_i32_1 = arith.constant 0 : i32
    return %c0_i32, %c0_i32_0 : i32, i32
  }
}

</mosaic_0001>

<bundles_post_ra>
// kernel: tpu_custom_call.1
= control target key start
LH: loop header
LB: loop body
LE: loop exit
PB: predicated region body
PF: predicated region fallthrough
CT: control target
= control target key end

     0   :  { %7 = vsyncpa [#allocation3], 0  ;;  %s210_s0 = inlined_call_operand.hbm [shape: f32[8,128], index: 0, kind: input, shape index: {}]   ;;  %s211_s1 = inlined_call_operand.hbm [shape: s32[8,128], index: 1, kind: input, shape index: {}]   ;;  %s212_s2 = inlined_call_operand.hbm [shape: f32[1,1], index: 2, kind: output, shape index: {}]  }
   0x1   :  { %8 = vsyncpa [#allocation6], 0 }
   0x2   :  { %9 = vsyncpa [#allocation4], 0  ;;  %s182_s9 = smov [#allocation2]   ;;  %s183_s11 = smov [#allocation5]  }
   0x3   :  { %s16_s10 = sshll.u32 %s182_s9, 4  ;;  %s26_s12 = sshll.u32 %s183_s11, 4  ;;  %s17_s10 = int_to_ptr.vmem [resolvable:$true] %s16_s10  ;;  %s27_s12 = int_to_ptr.vmem [resolvable:$true] %s26_s12 }
   0x4   :  { %s136_s13 = scalar_lea.vmem %s17_s10, 128  ;;  %p141_p1 = scmp.lt.s32.totalorder %s17_s10, %s17_s10 }
   0x5   :  { %p137_p0 = scmp.ne.s32.totalorder %s17_s10, %s136_s13  ;;  %p142_p2 = scmp.lt.s32.totalorder %s136_s13, %s136_s13 }
   0x7   :  { %p143_p3 = por %p142_p2, %p141_p1 }
   0x9   :  { %p144_p4 = pnand %p143_p3, %p137_p0 }
   0xb   :  { %147 = shalt.err (!%p144_p4)
}
   0xc   :  { %19 = dma.hbm_to_vmem [thread:$0]  %s210_s0, 128, %s17_s10, [#allocation3]  }
   0xd   :  { %s156_s16 = scalar_lea.vmem %s27_s12, 128  ;;  %p161_p6 = scmp.lt.s32.totalorder %s27_s12, %s27_s12 }
   0xe   :  { %p157_p5 = scmp.ne.s32.totalorder %s27_s12, %s156_s16  ;;  %p162_p7 = scmp.lt.s32.totalorder %s156_s16, %s156_s16 }
  0x10   :  { %p163_p8 = por %p162_p7, %p161_p6 }
  0x12   :  { %p164_p9 = pnand %p163_p8, %p157_p5 }
  0x14   :  { %167 = shalt.err (!%p164_p9)
}
  0x15   :  { %29 = dma.hbm_to_vmem [thread:$0]  %s211_s1, 128, %s27_s12, [#allocation6]  }
  0x16   :  { %176 = dma.done.wait [#allocation3], 128  }
  0x17   :  { %177 = vsyncadd [#allocation3], 4294967168 }
  0x18   :  { %178 = dma.done.wait [#allocation6], 128  }
  0x19   :  { %179 = vsyncadd [#allocation6], 4294967168  ;;  %v42_v0 = vld [vmem:[#allocation2] sm:$0xff]  ;;  %v44_v4 = vlaneseq  ;;  %v43_v9 = vld [vmem:[#allocation5] sm:$0xff]  ;;  %v184_v11 = vmov 0.0   ;;  %s185_s1 = smov [#allocation7]  }
  0x1a   :  { %v64_v1 = vand.u32 2147483647, %v42_v0  ;;  %v61_v14 = vmax.f32 %v42_v0, 0.0  ;;  %vm84_vm2 = vcmp.ge.s32.totalorder %v43_v9, 0 }
  0x1b   :  { %v45_v5 = vand.u32 127, %v44_v4 }
  0x1c   :  { %v65_v2 = vsub.f32 0.0, %v64_v1 }
  0x1d   :  { %v50_v8 = vand.u32 1, %v45_v5 }
  0x1e   :  { %v66_v3 = vmul.f32 1.442695, %v65_v2 }
  0x1f   :  { %vm58_vm0 = vcmp.eq.s32.totalorder %v43_v9, %v50_v8 }
  0x20   :  { %122 = vpow2.f32 %v66_v3  ;;  %v114_v12 = vsel %vm58_vm0, 1.0, %v184_v11 }
  0x21   :  { %v62_v15 = vmul.f32 %v114_v12, %v42_v0 }
  0x23   :  { %v63_v19 = vsub.f32 %v61_v14, %v62_v15 }
  0x2d   :  { %v123_v6 = vpop.eup %122 }
  0x2e   :  { %v68_v7 = vadd.f32 1.0, %v123_v6  ;;  %v71_v10 = vmul.f32 -0.5, %v123_v6  ;;  %v74_v16 = vand.u32 2147483647, %v123_v6 }
  0x30   :  { %124 = vlog2.f32 %v68_v7  ;;  %v72_v13 = vadd.f32 1.0, %v71_v10  ;;  %vm75_vm1 = vcmp.lt.f32.partialorder %v74_v16, 0.0004427343 }
  0x32   :  { %v73_v17 = vmul.f32 %v123_v6, %v72_v13 }
  0x3d   :  { %v125_v18 = vpop.eup %124 }
  0x3e   :  { %v70_v20 = vmul.f32 0.6931472, %v125_v18 }
  0x40   :  { %v76_v21 = vsel %vm75_vm1, %v73_v17, %v70_v20 }
  0x41   :  { %v77_v22 = vadd.f32 %v76_v21, %v63_v19 }
  0x43   :  { %v78_v23 = vsub.f32 0.0, %v77_v22 }
  0x45   :  { %v79_v24 = vmul.f32 1.442695, %v78_v23 }
  0x47   :  { %126 = vpow2.f32 %v79_v24 }
  0x54   :  { %v127_v25 = vpop.eup %126 }
  0x55   :  { %v81_v26 = vsub.f32 1.0, %v127_v25 }
  0x57   :  { %v82_v27 = vmul.f32 %v81_v26, %v81_v26 }
  0x59   :  { %v83_v28 = vmul.f32 %v82_v27, %v77_v22 }
  0x5b   :  { %v85_v29 = vsel %vm84_vm2, %v83_v28, 0.0 }
  0x5c   :  { %87 = vadd.xlane.f32.xlu0 %v85_v29 }
  0xe5   :  { %v88_v30 = vpop.xlane.xlu0 %87 }
  0xe6   :  { %v89_v31 = vrot.slane %v88_v30, 4 }
  0xe8   :  { %v90_v32 = vadd.f32 %v89_v31, %v88_v30 }
  0xea   :  { %v91_v33 = vrot.slane %v90_v32, 2 }
  0xec   :  { %v92_v34 = vadd.f32 %v91_v33, %v90_v32 }
  0xee   :  { %v93_v35 = vrot.slane %v92_v34, 1 }
  0xf0   :  { %v94_v36 = vadd.f32 %v93_v35, %v92_v34 }
  0xf2   :  { %115 = vpush %v94_v36 }
 0x123   :  { %s116_s0 = spop %115 }
 0x124   :  { %98 = sst [smem:[#allocation7]] %s116_s0 }
 0x125   :  { %106 = dma.smem_to_hbm %s185_s1, 16, %s212_s2, [#allocation4]  }
 0x126   :  { %180 = dma.done.wait [#allocation4], 16  }
 0x127   :  { %181 = vsyncadd [#allocation4], 4294967280 }
 0x128   :  { %110 = sfence }
 0x129   :  { %111 = vsyncpa [#allocation3], 1 }
 0x12a   :  { %112 = vsyncpa [#allocation6], 1 }
 0x12b   :  { %113 = vsyncpa [#allocation4], 1 }

</bundles_post_ra>
